<compile_context>
chip_gen: v7x
topology: tpu7x:2x2x1
jax: 0.10.0
libtpu: 0.0.40
codegen_flags: <defaults>
</compile_context>

<pallas_src>
import math
import jax
import jax.numpy as jnp
from jax.experimental import pallas as pl
from jax.experimental.pallas import tpu as pltpu

# ------------------------------------------------------------------ config
B, C, H, W = 2, 4, 16, 16          # batch / image shape (NCHW)
DX = C * H * W                     # flattened observation dim = 1024
DH = 32                            # hidden width
DZ = 8                             # latent dim
S = 2                              # num_samples
SB = S * B                         # fused sample*batch row count

_HALF_LOG_2PI = 0.5 * math.log(2.0 * math.pi)


# ------------------------------------------------------------------ kernel
def _vae_kernel(x_ref, eps_ref,
                w1e_ref, whe_ref, w1d_ref, whd_ref, bhd_ref, small_ref,
                enc_ref, z_ref, dec_ref, logs_ref):
    # x rows are pre-replicated across the S samples by the wrapper so that
    # every stage of the kernel runs as a single (S*B, feature) slab.
    x = x_ref[...]                                              # (SB, DX) f32
    eps = eps_ref[...]                                          # (SB, DZ) f32

    # ---- unpack the packed small parameters (one DMA for 5 tiny vectors) ----
    b1e = small_ref[0:1, :DH]                                   # (1, DH)
    bhe = small_ref[1:2, :2 * DZ]                               # (1, 2*DZ)
    b1d = small_ref[2:3, :DH]                                   # (1, DH)
    pmu = small_ref[3:4, :DZ]                                   # (1, DZ)
    plv = small_ref[4:5, :DZ]                                   # (1, DZ)

    # ---- encoder: h = tanh(x W1 + b1); fused [mu | logvar] head -------------
    # bf16 MXU inputs, f32 accumulation; elementwise math stays f32.
    h = jnp.tanh(jnp.dot(x.astype(jnp.bfloat16), w1e_ref[...],
                         preferred_element_type=jnp.float32) + b1e)
    enc = jnp.dot(h.astype(jnp.bfloat16), whe_ref[...],
                  preferred_element_type=jnp.float32) + bhe     # (SB, 2*DZ)
    enc_ref[...] = enc[:B]                                      # unique rows only

    mu_q = enc[:, :DZ]                                          # (SB, DZ)
    lv_q = enc[:, DZ:]                                          # (SB, DZ)

    # ---- rsample: z = mu + exp(0.5*logvar) * eps ----------------------------
    z = mu_q + jnp.exp(0.5 * lv_q) * eps                        # (SB, DZ)
    z_ref[...] = z

    # ---- log q(z|x): ((z - mu)/sigma)^2 == eps^2 by construction ------------
    lqzx = jnp.sum(-0.5 * eps * eps - 0.5 * lv_q - _HALF_LOG_2PI,
                   axis=-1, keepdims=True)                      # (SB, 1)

    # ---- log p(z): learnable diagonal Gaussian prior (constants hoisted) ----
    inv_pvar = jnp.exp(-plv)                                    # computed once
    plv_term = -0.5 * plv - _HALF_LOG_2PI                       # computed once
    dz = z - pmu
    lpz = jnp.sum(-0.5 * dz * dz * inv_pvar + plv_term,
                  axis=-1, keepdims=True)                       # (SB, 1)

    # ---- decoder: single batched matmul over all S*B rows -------------------
    # whd/bhd are read directly inside the dot expression (no value hoist).
    hd = jnp.tanh(jnp.dot(z.astype(jnp.bfloat16), w1d_ref[...],
                          preferred_element_type=jnp.float32) + b1d)
    dec = jnp.dot(hd.astype(jnp.bfloat16), whd_ref[...],
                  preferred_element_type=jnp.float32) + bhd_ref[...]  # (SB, 2*DX)
    dec_ref[...] = dec                                          # lane-dense store

    # ---- log p(x|z) over the whole (S*B, DX) slab ----------------------------
    mu_x = dec[:, :DX]                                          # 128-aligned slices
    lv_x = dec[:, DX:]
    diff = x - mu_x
    lpxz = jnp.sum(-0.5 * diff * diff * jnp.exp(-lv_x)
                   - 0.5 * lv_x - _HALF_LOG_2PI,
                   axis=-1, keepdims=True)                      # (SB, 1)

    # ---- merged log-prob output: one DMA instead of three -------------------
    logs_ref[0] = lqzx
    logs_ref[1] = lpz
    logs_ref[2] = lpxz


# ------------------------------------------------------------------ wrapper
def vae_forward(x, params, eps):
    """Mirrors VAE.forward(x, num_samples=S) with a single fused Pallas call."""
    (w1e, b1e, whe, bhe, w1d, b1d, whd, bhd, pmu, plv) = params

    # Present everything as a single (S*B, feature) slab so the kernel runs
    # one batched matmul per layer (no per-sample loop, no in-kernel relayout).
    x_flat = x.reshape(B, DX)
    x_tiled = jnp.broadcast_to(x_flat[None], (S, B, DX)).reshape(SB, DX)
    eps2 = eps.reshape(SB, DZ)

    # Pack the five tiny parameter vectors into one (8, 128) buffer (1 DMA).
    small = jnp.zeros((8, 128), jnp.float32)
    small = small.at[0, :DH].set(b1e.reshape(DH))
    small = small.at[1, :2 * DZ].set(bhe.reshape(2 * DZ))
    small = small.at[2, :DH].set(b1d.reshape(DH))
    small = small.at[3, :DZ].set(pmu.reshape(DZ))
    small = small.at[4, :DZ].set(plv.reshape(DZ))

    vmem = pl.BlockSpec(memory_space=pltpu.MemorySpace.VMEM)
    enc, z2, dec, logs = pl.pallas_call(
        _vae_kernel,
        out_shape=(
            jax.ShapeDtypeStruct((B, 2 * DZ), jnp.float32),      # [mu_q | lv_q]
            jax.ShapeDtypeStruct((SB, DZ), jnp.float32),         # z (flattened S*B)
            jax.ShapeDtypeStruct((SB, 2 * DX), jnp.float32),     # [mu_x | lv_x]
            jax.ShapeDtypeStruct((3, SB, 1), jnp.float32),       # [log_qz_x; log_pz; log_px_z]
        ),
        in_specs=[vmem] * 8,
        out_specs=(vmem,) * 4,
    )(x_tiled, eps2, w1e, whe, w1d, whd, bhd, small)

    # split fused heads / merged logs in the wrapper (free XLA slices)
    mu_q = enc[:, :DZ]
    lv_q = enc[:, DZ:]
    z = z2.reshape(S, B, DZ)
    mu_x = dec[:, :DX].reshape(S, B, C, H, W)
    lv_x = dec[:, DX:].reshape(S, B, C, H, W)
    log_qz_x = logs[0].reshape(S, B)
    log_pz = logs[1].reshape(S, B)
    log_px_z = logs[2].reshape(S, B)

    # TODO(synk): torch Distribution objects have no Pallas equivalent;
    # px_z_dist / qz_x_dist are returned as their (mu, logvar) parameter tuples.
    return {
        'x': x,
        'z': z,
        'log_px_z': log_px_z,
        'log_pz': log_pz,
        'log_qz_x': log_qz_x,
        'px_z_dist': (mu_x, lv_x),
        'qz_x_dist': (mu_q, lv_q),
    }


# ------------------------------------------------------------------ params
def _init_params(key):
    # In the PyTorch module the mu/logvar heads are separate nn.Linear layers;
    # here their weights are stored concatenated along the output (lane) axis
    # as a layout optimization: [W_mu | W_logvar]. Weights are kept in bf16
    # (MXU inputs); biases / prior / all log-prob math stay f32.
    ks = jax.random.split(key, 4)
    scale = 0.1
    w1e = (scale * jax.random.normal(ks[0], (DX, DH), jnp.float32)).astype(jnp.bfloat16)
    b1e = jnp.zeros((1, DH), jnp.float32)
    whe = (scale * jax.random.normal(ks[1], (DH, 2 * DZ), jnp.float32)).astype(jnp.bfloat16)
    bhe = jnp.zeros((1, 2 * DZ), jnp.float32)
    w1d = (scale * jax.random.normal(ks[2], (DZ, DH), jnp.float32)).astype(jnp.bfloat16)
    b1d = jnp.zeros((1, DH), jnp.float32)
    whd = (scale * jax.random.normal(ks[3], (DH, 2 * DX), jnp.float32)).astype(jnp.bfloat16)
    bhd = jnp.zeros((1, 2 * DX), jnp.float32)
    pmu = jnp.zeros((1, DZ), jnp.float32)      # prior mean (learnable in torch)
    plv = jnp.zeros((1, DZ), jnp.float32)      # prior logvar (learnable in torch)
    return (w1e, b1e, whe, bhe, w1d, b1d, whd, bhd, pmu, plv)


# ------------------------------------------------------------------ main
if __name__ == "__main__":
    key = jax.random.PRNGKey(0)
    kx, keps, kp = jax.random.split(key, 3)

    x = jax.random.normal(kx, (B, C, H, W), jnp.float32)        # NCHW input
    eps = jax.random.normal(keps, (S, B, DZ), jnp.float32)      # rsample noise
    params = _init_params(kp)

    out = jax.jit(vae_forward)(x, params, eps)
    jax.block_until_ready(out)

    assert out['z'].shape == (S, B, DZ)
    assert out['log_px_z'].shape == (S, B)
    assert out['log_pz'].shape == (S, B)
    assert out['log_qz_x'].shape == (S, B)
    assert out['px_z_dist'][0].shape == (S, B, C, H, W)
    assert out['px_z_dist'][1].shape == (S, B, C, H, W)
    assert out['qz_x_dist'][0].shape == (B, DZ)
    assert out['qz_x_dist'][1].shape == (B, DZ)
    print("KERNEL_OK")
</pallas_src>

<mosaic_0001>
module attributes {stable_mosaic.version = 11 : i64} {
  func.func @_vae_kernel(%arg0: memref<4x1024xf32, #tpu.memory_space<vmem>>, %arg1: memref<4x8xf32, #tpu.memory_space<vmem>>, %arg2: memref<1024x32xbf16, #tpu.memory_space<vmem>>, %arg3: memref<32x16xbf16, #tpu.memory_space<vmem>>, %arg4: memref<8x32xbf16, #tpu.memory_space<vmem>>, %arg5: memref<32x2048xbf16, #tpu.memory_space<vmem>>, %arg6: memref<1x2048xf32, #tpu.memory_space<vmem>>, %arg7: memref<8x128xf32, #tpu.memory_space<vmem>>, %arg8: memref<2x16xf32, #tpu.memory_space<vmem>>, %arg9: memref<4x8xf32, #tpu.memory_space<vmem>>, %arg10: memref<4x2048xf32, #tpu.memory_space<vmem>>, %arg11: memref<3x4x1xf32, #tpu.memory_space<vmem>>) attributes {dimension_semantics = [], scalar_prefetch = 0 : i64, scratch_operands = 0 : i64, tpu.core_type = #tpu.core_type<tc>} {
    %c0 = arith.constant 0 : index
    %c0_0 = arith.constant 0 : index
    %0 = vector.load %arg0[%c0, %c0_0] : memref<4x1024xf32, #tpu.memory_space<vmem>>, vector<4x1024xf32>
    %c0_1 = arith.constant 0 : index
    %c0_2 = arith.constant 0 : index
    %1 = vector.load %arg1[%c0_1, %c0_2] : memref<4x8xf32, #tpu.memory_space<vmem>>, vector<4x8xf32>
    %c0_3 = arith.constant 0 : index
    %c0_4 = arith.constant 0 : index
    %2 = vector.load %arg7[%c0_3, %c0_4] : memref<8x128xf32, #tpu.memory_space<vmem>>, vector<1x32xf32>
    %c1 = arith.constant 1 : index
    %c0_5 = arith.constant 0 : index
    %3 = vector.load %arg7[%c1, %c0_5] : memref<8x128xf32, #tpu.memory_space<vmem>>, vector<1x16xf32>
    %c2 = arith.constant 2 : index
    %c0_6 = arith.constant 0 : index
    %4 = vector.load %arg7[%c2, %c0_6] : memref<8x128xf32, #tpu.memory_space<vmem>>, vector<1x32xf32>
    %c3 = arith.constant 3 : index
    %c0_7 = arith.constant 0 : index
    %5 = vector.load %arg7[%c3, %c0_7] : memref<8x128xf32, #tpu.memory_space<vmem>>, vector<1x8xf32>
    %c4 = arith.constant 4 : index
    %c0_8 = arith.constant 0 : index
    %6 = vector.load %arg7[%c4, %c0_8] : memref<8x128xf32, #tpu.memory_space<vmem>>, vector<1x8xf32>
    %7 = arith.truncf %0 : vector<4x1024xf32> to vector<4x1024xbf16>
    %c0_9 = arith.constant 0 : index
    %c0_10 = arith.constant 0 : index
    %8 = vector.load %arg2[%c0_9, %c0_10] : memref<1024x32xbf16, #tpu.memory_space<vmem>>, vector<1024x32xbf16>
    %cst = arith.constant dense<0.000000e+00> : vector<4x32xf32>
    %9 = tpu.matmul %7, %8, %cst {dimension_numbers = #tpu.dot_dimension_numbers<[1], [0], [0], [1], [0, 0, 1, 1], [], []>} : vector<4x1024xbf16>, vector<1024x32xbf16>, vector<4x32xf32> -> vector<4x32xf32>
    %10 = vector.broadcast %2 : vector<1x32xf32> to vector<4x32xf32>
    %11 = arith.addf %9, %10 : vector<4x32xf32>
    %12 = math.tanh %11 : vector<4x32xf32>
    %13 = arith.truncf %12 : vector<4x32xf32> to vector<4x32xbf16>
    %c0_11 = arith.constant 0 : index
    %c0_12 = arith.constant 0 : index
    %14 = vector.load %arg3[%c0_11, %c0_12] : memref<32x16xbf16, #tpu.memory_space<vmem>>, vector<32x16xbf16>
    %cst_13 = arith.constant dense<0.000000e+00> : vector<4x16xf32>
    %15 = tpu.matmul %13, %14, %cst_13 {dimension_numbers = #tpu.dot_dimension_numbers<[1], [0], [0], [1], [0, 0, 1, 1], [], []>} : vector<4x32xbf16>, vector<32x16xbf16>, vector<4x16xf32> -> vector<4x16xf32>
    %16 = vector.broadcast %3 : vector<1x16xf32> to vector<4x16xf32>
    %17 = arith.addf %15, %16 : vector<4x16xf32>
    %18 = vector.extract_strided_slice %17 {offsets = [0, 0], sizes = [2, 16], strides = [1, 1]} : vector<4x16xf32> to vector<2x16xf32>
    %c0_14 = arith.constant 0 : index
    %c0_15 = arith.constant 0 : index
    %19 = vector.load %arg8[%c0_14, %c0_15] : memref<2x16xf32, #tpu.memory_space<vmem>>, vector<2x16xf32>
    tpu.vector_store %arg8[%c0_14, %c0_15], %18 {strides = array<i32>} : memref<2x16xf32, #tpu.memory_space<vmem>>, vector<2x16xf32>,
    %20 = vector.extract_strided_slice %17 {offsets = [0, 0], sizes = [4, 8], strides = [1, 1]} : vector<4x16xf32> to vector<4x8xf32>
    %21 = vector.extract_strided_slice %17 {offsets = [0, 8], sizes = [4, 8], strides = [1, 1]} : vector<4x16xf32> to vector<4x8xf32>
    %cst_16 = arith.constant 5.000000e-01 : f32
    %22 = vector.broadcast %cst_16 : f32 to vector<4x8xf32>
    %23 = arith.mulf %22, %21 : vector<4x8xf32>
    %24 = math.exp %23 : vector<4x8xf32>
    %25 = arith.mulf %24, %1 : vector<4x8xf32>
    %26 = arith.addf %20, %25 : vector<4x8xf32>
    %c0_17 = arith.constant 0 : index
    %c0_18 = arith.constant 0 : index
    %27 = vector.load %arg9[%c0_17, %c0_18] : memref<4x8xf32, #tpu.memory_space<vmem>>, vector<4x8xf32>
    tpu.vector_store %arg9[%c0_17, %c0_18], %26 {strides = array<i32>} : memref<4x8xf32, #tpu.memory_space<vmem>>, vector<4x8xf32>,
    %cst_19 = arith.constant -5.000000e-01 : f32
    %28 = vector.broadcast %cst_19 : f32 to vector<4x8xf32>
    %29 = arith.mulf %28, %1 : vector<4x8xf32>
    %30 = arith.mulf %29, %1 : vector<4x8xf32>
    %cst_20 = arith.constant 5.000000e-01 : f32
    %31 = vector.broadcast %cst_20 : f32 to vector<4x8xf32>
    %32 = arith.mulf %31, %21 : vector<4x8xf32>
    %33 = arith.subf %30, %32 : vector<4x8xf32>
    %cst_21 = arith.constant 0.918938517 : f32
    %34 = vector.broadcast %cst_21 : f32 to vector<4x8xf32>
    %35 = arith.subf %33, %34 : vector<4x8xf32>
    %cst_22 = arith.constant dense<0.000000e+00> : vector<4xf32>
    %36 = vector.multi_reduction <add>, %35, %cst_22 [1] : vector<4x8xf32> to vector<4xf32>
    %37 = vector.shape_cast %36 : vector<4xf32> to vector<4x1xf32>
    %cst_23 = arith.constant 0.000000e+00 : f32
    %38 = vector.broadcast %cst_23 : f32 to vector<1x8xf32>
    %39 = arith.subf %38, %6 : vector<1x8xf32>
    %40 = math.exp %39 : vector<1x8xf32>
    %cst_24 = arith.constant -5.000000e-01 : f32
    %41 = vector.broadcast %cst_24 : f32 to vector<1x8xf32>
    %42 = arith.mulf %41, %6 : vector<1x8xf32>
    %cst_25 = arith.constant 0.918938517 : f32
    %43 = vector.broadcast %cst_25 : f32 to vector<1x8xf32>
    %44 = arith.subf %42, %43 : vector<1x8xf32>
    %45 = vector.broadcast %5 : vector<1x8xf32> to vector<4x8xf32>
    %46 = arith.subf %26, %45 : vector<4x8xf32>
    %cst_26 = arith.constant -5.000000e-01 : f32
    %47 = vector.broadcast %cst_26 : f32 to vector<4x8xf32>
    %48 = arith.mulf %47, %46 : vector<4x8xf32>
    %49 = arith.mulf %48, %46 : vector<4x8xf32>
    %50 = vector.broadcast %40 : vector<1x8xf32> to vector<4x8xf32>
    %51 = arith.mulf %49, %50 : vector<4x8xf32>
    %52 = vector.broadcast %44 : vector<1x8xf32> to vector<4x8xf32>
    %53 = arith.addf %51, %52 : vector<4x8xf32>
    %cst_27 = arith.constant dense<0.000000e+00> : vector<4xf32>
    %54 = vector.multi_reduction <add>, %53, %cst_27 [1] : vector<4x8xf32> to vector<4xf32>
    %55 = vector.shape_cast %54 : vector<4xf32> to vector<4x1xf32>
    %56 = arith.truncf %26 : vector<4x8xf32> to vector<4x8xbf16>
    %c0_28 = arith.constant 0 : index
    %c0_29 = arith.constant 0 : index
    %57 = vector.load %arg4[%c0_28, %c0_29] : memref<8x32xbf16, #tpu.memory_space<vmem>>, vector<8x32xbf16>
    %cst_30 = arith.constant dense<0.000000e+00> : vector<4x32xf32>
    %58 = tpu.matmul %56, %57, %cst_30 {dimension_numbers = #tpu.dot_dimension_numbers<[1], [0], [0], [1], [0, 0, 1, 1], [], []>} : vector<4x8xbf16>, vector<8x32xbf16>, vector<4x32xf32> -> vector<4x32xf32>
    %59 = vector.broadcast %4 : vector<1x32xf32> to vector<4x32xf32>
    %60 = arith.addf %58, %59 : vector<4x32xf32>
    %61 = math.tanh %60 : vector<4x32xf32>
    %62 = arith.truncf %61 : vector<4x32xf32> to vector<4x32xbf16>
    %c0_31 = arith.constant 0 : index
    %c0_32 = arith.constant 0 : index
    %63 = vector.load %arg5[%c0_31, %c0_32] : memref<32x2048xbf16, #tpu.memory_space<vmem>>, vector<32x2048xbf16>
    %cst_33 = arith.constant dense<0.000000e+00> : vector<4x2048xf32>
    %64 = tpu.matmul %62, %63, %cst_33 {dimension_numbers = #tpu.dot_dimension_numbers<[1], [0], [0], [1], [0, 0, 1, 1], [], []>} : vector<4x32xbf16>, vector<32x2048xbf16>, vector<4x2048xf32> -> vector<4x2048xf32>
    %c0_34 = arith.constant 0 : index
    %c0_35 = arith.constant 0 : index
    %65 = vector.load %arg6[%c0_34, %c0_35] : memref<1x2048xf32, #tpu.memory_space<vmem>>, vector<1x2048xf32>
    %66 = vector.broadcast %65 : vector<1x2048xf32> to vector<4x2048xf32>
    %67 = arith.addf %64, %66 : vector<4x2048xf32>
    %c0_36 = arith.constant 0 : index
    %c0_37 = arith.constant 0 : index
    %68 = vector.load %arg10[%c0_36, %c0_37] : memref<4x2048xf32, #tpu.memory_space<vmem>>, vector<4x2048xf32>
    tpu.vector_store %arg10[%c0_36, %c0_37], %67 {strides = array<i32>} : memref<4x2048xf32, #tpu.memory_space<vmem>>, vector<4x2048xf32>,
    %69 = vector.extract_strided_slice %67 {offsets = [0, 0], sizes = [4, 1024], strides = [1, 1]} : vector<4x2048xf32> to vector<4x1024xf32>
    %70 = vector.extract_strided_slice %67 {offsets = [0, 1024], sizes = [4, 1024], strides = [1, 1]} : vector<4x2048xf32> to vector<4x1024xf32>
    %71 = arith.subf %0, %69 : vector<4x1024xf32>
    %cst_38 = arith.constant -5.000000e-01 : f32
    %72 = vector.broadcast %cst_38 : f32 to vector<4x1024xf32>
    %73 = arith.mulf %72, %71 : vector<4x1024xf32>
    %74 = arith.mulf %73, %71 : vector<4x1024xf32>
    %cst_39 = arith.constant 0.000000e+00 : f32
    %75 = vector.broadcast %cst_39 : f32 to vector<4x1024xf32>
    %76 = arith.subf %75, %70 : vector<4x1024xf32>
    %77 = math.exp %76 : vector<4x1024xf32>
    %78 = arith.mulf %74, %77 : vector<4x1024xf32>
    %cst_40 = arith.constant 5.000000e-01 : f32
    %79 = vector.broadcast %cst_40 : f32 to vector<4x1024xf32>
    %80 = arith.mulf %79, %70 : vector<4x1024xf32>
    %81 = arith.subf %78, %80 : vector<4x1024xf32>
    %cst_41 = arith.constant 0.918938517 : f32
    %82 = vector.broadcast %cst_41 : f32 to vector<4x1024xf32>
    %83 = arith.subf %81, %82 : vector<4x1024xf32>
    %cst_42 = arith.constant dense<0.000000e+00> : vector<4xf32>
    %84 = vector.multi_reduction <add>, %83, %cst_42 [1] : vector<4x1024xf32> to vector<4xf32>
    %85 = vector.shape_cast %84 : vector<4xf32> to vector<4x1xf32>
    %c0_43 = arith.constant 0 : index
    %c0_44 = arith.constant 0 : index
    %c0_45 = arith.constant 0 : index
    %86 = vector.load %arg11[%c0_43, %c0_44, %c0_45] : memref<3x4x1xf32, #tpu.memory_space<vmem>>, vector<1x4x1xf32>
    %87 = vector.shape_cast %86 : vector<1x4x1xf32> to vector<4x1xf32>
    %88 = vector.shape_cast %37 : vector<4x1xf32> to vector<1x4x1xf32>
    tpu.vector_store %arg11[%c0_43, %c0_44, %c0_45], %88 {strides = array<i32>} : memref<3x4x1xf32, #tpu.memory_space<vmem>>, vector<1x4x1xf32>,
    %c1_46 = arith.constant 1 : index
    %c0_47 = arith.constant 0 : index
    %c0_48 = arith.constant 0 : index
    %89 = vector.load %arg11[%c1_46, %c0_47, %c0_48] : memref<3x4x1xf32, #tpu.memory_space<vmem>>, vector<1x4x1xf32>
    %90 = vector.shape_cast %89 : vector<1x4x1xf32> to vector<4x1xf32>
    %91 = vector.shape_cast %55 : vector<4x1xf32> to vector<1x4x1xf32>
    tpu.vector_store %arg11[%c1_46, %c0_47, %c0_48], %91 {strides = array<i32>} : memref<3x4x1xf32, #tpu.memory_space<vmem>>, vector<1x4x1xf32>,
    %c2_49 = arith.constant 2 : index
    %c0_50 = arith.constant 0 : index
    %c0_51 = arith.constant 0 : index
    %92 = vector.load %arg11[%c2_49, %c0_50, %c0_51] : memref<3x4x1xf32, #tpu.memory_space<vmem>>, vector<1x4x1xf32>
    %93 = vector.shape_cast %92 : vector<1x4x1xf32> to vector<4x1xf32>
    %94 = vector.shape_cast %85 : vector<4x1xf32> to vector<1x4x1xf32>
    tpu.vector_store %arg11[%c2_49, %c0_50, %c0_51], %94 {strides = array<i32>} : memref<3x4x1xf32, #tpu.memory_space<vmem>>, vector<1x4x1xf32>,
    return
  }
}

</mosaic_0001>

<bundles_post_ra>
// kernel: squeeze.3
= control target key start
LH: loop header
LB: loop body
LE: loop exit
PB: predicated region body
PF: predicated region fallthrough
CT: control target
= control target key end

     0   :  { %s85_s0 = inlined_call_operand.vmem [shape: f32[4], index: 0, kind: input, shape index: {}]   ;;  %s86_s1 = inlined_call_operand.hbm [shape: f32[2,2], index: 1, kind: output, shape index: {}]  }
   0x1   :  { %v5_v0 = vld [vmem:[%s85_s0] sm:$0x1] }
   0x2   :  { %2 = vsyncpa [#allocation1], 0  ;;  %6 = vst [vmem:[#allocation3] sm:$0x1] %v5_v0  ;;  %vm8_vm0 = vcmask 15360   ;;  %s58_s0 = smov 126  }
   0x3   :  { %s59_s8 = smov [#allocation0]  }
   0x4   :  { %s26_s9 = sshll.u32 %s59_s8, 4  ;;  %s27_s9 = int_to_ptr.vmem [resolvable:$true] %s26_s9 }
   0x5   :  { %s34_s10 = scalar_lea.vmem %s27_s9, 32  ;;  %p39_p1 = scmp.lt.s32.totalorder %s27_s9, %s27_s9 }
   0x6   :  { %p35_p0 = scmp.ne.s32.totalorder %s27_s9, %s34_s10  ;;  %p40_p2 = scmp.lt.s32.totalorder %s34_s10, %s34_s10 }
   0x8   :  { %p41_p3 = por %p40_p2, %p39_p1 }
   0x9   :  { %v10_v1 = vld [vmem:[#allocation3] sm:$0x1]  }
   0xa   :  { %v7_v2 = vld [vmem:[#allocation3] sm:$0x1]   ;;  %11 = vrot.lane.b32.xlu0 %v10_v1, %s58_s0  ;;  %p42_p4 = pnand %p41_p3, %p35_p0 }
   0xb   :  { %9 = vst.msk [vmem:[#allocation2] sm:$0x1] %vm8_vm0, %v7_v2  }
  0x7c   :  { %v12_v3 = vpop.permute.xlu0 %11  }
  0x7d   :  { %15 = vst.msk [vmem:[#allocation2 + $0x1] sm:$0x1] %vm8_vm0, %v12_v3  }
  0x84   :  { %v19_v4 = vld [vmem:[#allocation2] sm:$0x3] }
  0x85   :  { %21 = vst [vmem:[#allocation0] sm:$0x3] %v19_v4 }
  0x86   :  { %45 = shalt.err (!%p42_p4)
}
  0x87   :  { %s46_s13 = scalar_lea.hbm %s86_s1, 32 }
  0x88   :  { %p47_p5 = scmp.ne.s32.totalorder %s86_s1, %s46_s13  ;;  %p50_p6 = scmp.lt.u32.totalorder %s46_s13, %s86_s1 }
  0x8a   :  { %p52_p7 = pnand %p50_p6, %p47_p5 }
  0x8c   :  { %55 = shalt.err (!%p52_p7)
}
  0x8d   :  { %29 = dma.vmem_to_hbm [thread:$0]  %s27_s9, 32, %s86_s1, [#allocation1]  }
  0x8e   :  { %56 = dma.done.wait [#allocation1], 32  }
  0x8f   :  { %57 = vsyncadd [#allocation1], 4294967264 }
  0x90   :  { %31 = vsyncpa [#allocation1], 1 }

// kernel: vae_forward.1
= control target key start
LH: loop header
LB: loop body
LE: loop exit
PB: predicated region body
PF: predicated region fallthrough
CT: control target
= control target key end

     0   :  { %s2632_s0 = inlined_call_operand.vmem [shape: f32[4,1024], index: 0, kind: input, shape index: {}]   ;;  %s2633_s1 = inlined_call_operand.vmem [shape: f32[4,8], index: 1, kind: input, shape index: {}]   ;;  %s2634_s2 = inlined_call_operand.vmem [shape: bf16[1024,32], index: 2, kind: input, shape index: {}]   ;;  %s2635_s3 = inlined_call_operand.vmem [shape: bf16[32,16], index: 3, kind: input, shape index: {}]   ;;  %s2636_s4 = inlined_call_operand.vmem [shape: bf16[8,32], index: 4, kind: input, shape index: {}]   ;;  %s2637_s5 = inlined_call_operand.vmem [shape: bf16[32,2048], index: 5, kind: input, shape index: {}]   ;;  %s2638_s6 = inlined_call_operand.vmem [shape: f32[1,2048], index: 6, kind: input, shape index: {}]   ;;  %s2639_s7 = inlined_call_operand.vmem [shape: f32[8,128], index: 7, kind: input, shape index: {}]   ;;  %s2640_s8 = inlined_call_operand.vmem [shape: f32[2,16], index: 8, kind: output, shape index: {0}]   ;;  %s2641_s9 = inlined_call_operand.hbm [shape: f32[4,8], index: 9, kind: output, shape index: {1}]   ;;  %s2642_s10 = inlined_call_operand.vmem [shape: f32[4,2048], index: 10, kind: output, shape index: {2}]   ;;  %s2643_s11 = inlined_call_operand.vmem [shape: f32[3,4,1], index: 11, kind: output, shape index: {3}]  }
   0x1   :  { %v1945_v0 = vld [vmem:[%s2634_s2 + $0x40] sm:$0xff]   ;;  %v1949_v4 = vld [vmem:[%s2634_s2 + $0x48] sm:$0xff]   ;;  %v1953_v8 = vld [vmem:[%s2634_s2 + $0x50] sm:$0xff]  }
   0x2   :  { %v1946_v1 = vld [vmem:[%s2634_s2 + $0xc0] sm:$0xff]   ;;  %1832 = vmatprep.subr.bf16.mxu0 %v1945_v0  ;;  %v1950_v5 = vld [vmem:[%s2634_s2 + $0xc8] sm:$0xff]   ;;  %v1954_v9 = vld [vmem:[%s2634_s2 + $0xd0] sm:$0xff]  }
   0x3   :  { %v1947_v2 = vld [vmem:[%s2634_s2] sm:$0xff]   ;;  %1854 = vmatprep.subr.bf16.mxu1 %v1946_v1  ;;  %v1951_v6 = vld [vmem:[%s2634_s2 + $0x8] sm:$0xff]   ;;  %v1955_v10 = vld [vmem:[%s2634_s2 + $0x10] sm:$0xff]  }
   0x4   :  { %v1948_v3 = vld [vmem:[%s2634_s2 + $0x80] sm:$0xff]   ;;  %1833 = vmatpush3.bf16.msra.mxu0 %v1947_v2  ;;  %v1952_v7 = vld [vmem:[%s2634_s2 + $0x88] sm:$0xff]   ;;  %v1956_v11 = vld [vmem:[%s2634_s2 + $0x90] sm:$0xff]  }
   0x5   :  { %1855 = vmatpush3.bf16.msra.mxu1 %v1948_v3  ;;  %1834 = vmatprep.subr.bf16.mxu0 %v1949_v4  ;;  %v1957_v12 = vld [vmem:[%s2634_s2 + $0x58] sm:$0xff]   ;;  %v1961_v16 = vld [vmem:[%s2634_s2 + $0x60] sm:$0xff]   ;;  %v1965_v20 = vld [vmem:[%s2634_s2 + $0x68] sm:$0xff]  }
   0x6   :  { %1856 = vmatprep.subr.bf16.mxu1 %v1950_v5  ;;  %v1958_v13 = vld [vmem:[%s2634_s2 + $0xd8] sm:$0xff]   ;;  %v1962_v17 = vld [vmem:[%s2634_s2 + $0xe0] sm:$0xff]   ;;  %v1966_v21 = vld [vmem:[%s2634_s2 + $0xe8] sm:$0xff]  }
   0x7   :  { %v1959_v14 = vld [vmem:[%s2634_s2 + $0x18] sm:$0xff]   ;;  %v1963_v18 = vld [vmem:[%s2634_s2 + $0x20] sm:$0xff]   ;;  %v1967_v22 = vld [vmem:[%s2634_s2 + $0x28] sm:$0xff]  }
   0x8   :  { %1835 = vmatpush3.bf16.msra.mxu0 %v1951_v6  ;;  %v1960_v15 = vld [vmem:[%s2634_s2 + $0x98] sm:$0xff]   ;;  %v1964_v19 = vld [vmem:[%s2634_s2 + $0xa0] sm:$0xff]   ;;  %v1968_v23 = vld [vmem:[%s2634_s2 + $0xa8] sm:$0xff]  }
   0x9   :  { %1857 = vmatpush3.bf16.msra.mxu1 %v1952_v7  ;;  %1836 = vmatprep.subr.bf16.mxu0 %v1953_v8  ;;  %v1969_v24 = vld [vmem:[%s2634_s2 + $0x70] sm:$0xff]   ;;  %v1973_v28 = vld [vmem:[%s2634_s2 + $0x78] sm:$0xff]   ;;  %v2228_v32 = vld [vmem:[%s2632_s0] sm:$0xff] }
   0xa   :  { %1858 = vmatprep.subr.bf16.mxu1 %v1954_v9  ;;  %v1970_v25 = vld [vmem:[%s2634_s2 + $0xf0] sm:$0xff]   ;;  %v1974_v29 = vld [vmem:[%s2634_s2 + $0xf8] sm:$0xff]   ;;  %v2233_v33 = vld [vmem:[%s2632_s0 + $0x8] sm:$0xff]  ;;  %v49_v34 = vcombine.high %v2228_v32, %v2228_v32  ;;  %v57_v37 = vpack.c.bf16 %v2228_v32, %v2228_v32 }
   0xb   :  { %v1971_v26 = vld [vmem:[%s2634_s2 + $0x30] sm:$0xff]   ;;  %v1975_v30 = vld [vmem:[%s2634_s2 + $0x38] sm:$0xff]   ;;  %v50_v35 = vcombine.high %v2233_v33, %v2233_v33  ;;  %v1979_v36 = vld [vmem:[%s2634_s2 + $0x140] sm:$0xff]   ;;  %v59_v38 = vpack.c.bf16 %v2233_v33, %v2233_v33 }
   0xc   :  { %1837 = vmatpush3.bf16.msra.mxu0 %v1955_v10  ;;  %v1972_v27 = vld [vmem:[%s2634_s2 + $0xb0] sm:$0xff]   ;;  %v1976_v31 = vld [vmem:[%s2634_s2 + $0xb8] sm:$0xff]   ;;  %v1980_v39 = vld [vmem:[%s2634_s2 + $0x1c0] sm:$0xff]   ;;  %v58_v40 = vpack.c.bf16 %v49_v34, %v49_v34 }
   0xd   :  { %1859 = vmatpush3.bf16.msra.mxu1 %v1956_v11  ;;  %1838 = vmatprep.subr.bf16.mxu0 %v1957_v12  ;;  %v60_v41 = vpack.c.bf16 %v50_v35, %v50_v35  ;;  %v1981_v42 = vld [vmem:[%s2634_s2 + $0x100] sm:$0xff]   ;;  %v1983_v44 = vld [vmem:[%s2634_s2 + $0x148] sm:$0xff]   ;;  %v1987_v48 = vld [vmem:[%s2634_s2 + $0x150] sm:$0xff]  }
   0xe   :  { %1860 = vmatprep.subr.bf16.mxu1 %v1958_v13  ;;  %v1982_v43 = vld [vmem:[%s2634_s2 + $0x180] sm:$0xff]   ;;  %613 = vmatprep.mubr.bf16.mxu0 %v58_v40  ;;  %v1984_v45 = vld [vmem:[%s2634_s2 + $0x1c8] sm:$0xff]   ;;  %v1988_v49 = vld [vmem:[%s2634_s2 + $0x1d0] sm:$0xff]  }
   0xf   :  { %653 = vmatprep.mubr.bf16.mxu1 %v60_v41  ;;  %v1985_v46 = vld [vmem:[%s2634_s2 + $0x108] sm:$0xff]   ;;  %v1989_v50 = vld [vmem:[%s2634_s2 + $0x110] sm:$0xff]   ;;  %v1991_v52 = vld [vmem:[%s2634_s2 + $0x158] sm:$0xff]  }
  0x10   :  { %1839 = vmatpush3.bf16.msra.mxu0 %v1959_v14  ;;  %v1986_v47 = vld [vmem:[%s2634_s2 + $0x188] sm:$0xff]   ;;  %v1990_v51 = vld [vmem:[%s2634_s2 + $0x190] sm:$0xff]   ;;  %v1992_v53 = vld [vmem:[%s2634_s2 + $0x1d8] sm:$0xff]  }
  0x11   :  { %1861 = vmatpush3.bf16.msra.mxu1 %v1960_v15  ;;  %1840 = vmatprep.subr.bf16.mxu0 %v1961_v16  ;;  %v1993_v54 = vld [vmem:[%s2634_s2 + $0x118] sm:$0xff]   ;;  %v1995_v56 = vld [vmem:[%s2634_s2 + $0x160] sm:$0xff]   ;;  %v1999_v60 = vld [vmem:[%s2634_s2 + $0x168] sm:$0xff]  }
  0x12   :  { %1862 = vmatprep.subr.bf16.mxu1 %v1962_v17  ;;  %v1994_v55 = vld [vmem:[%s2634_s2 + $0x198] sm:$0xff]   ;;  %v1996_v57 = vld [vmem:[%s2634_s2 + $0x1e0] sm:$0xff]   ;;  %v2000_v61 = vld [vmem:[%s2634_s2 + $0x1e8] sm:$0xff]  }
  0x13   :  { %v1997_v58 = vld [vmem:[%s2634_s2 + $0x120] sm:$0xff]   ;;  %v2001_v62 = vld [vmem:[%s2634_s2 + $0x128] sm:$0xff]   ;;  %v2003_v0 = vld [vmem:[%s2634_s2 + $0x170] sm:$0xff]  }
  0x14   :  { %1841 = vmatpush3.bf16.msra.mxu0 %v1963_v18  ;;  %v1998_v59 = vld [vmem:[%s2634_s2 + $0x1a0] sm:$0xff]   ;;  %v2002_v63 = vld [vmem:[%s2634_s2 + $0x1a8] sm:$0xff]   ;;  %v2004_v1 = vld [vmem:[%s2634_s2 + $0x1f0] sm:$0xff]  }
  0x15   :  { %1863 = vmatpush3.bf16.msra.mxu1 %v1964_v19  ;;  %1842 = vmatprep.subr.bf16.mxu0 %v1965_v20  ;;  %v2005_v2 = vld [vmem:[%s2634_s2 + $0x130] sm:$0xff]   ;;  %v2007_v4 = vld [vmem:[%s2634_s2 + $0x178] sm:$0xff]  }
  0x16   :  { %1864 = vmatprep.subr.bf16.mxu1 %v1966_v21  ;;  %v2006_v3 = vld [vmem:[%s2634_s2 + $0x1b0] sm:$0xff]   ;;  %v2008_v5 = vld [vmem:[%s2634_s2 + $0x1f8] sm:$0xff]  }
  0x17   :  { %v2009_v6 = vld [vmem:[%s2634_s2 + $0x138] sm:$0xff]   ;;  %v2342_v8 = vld [vmem:[%s2632_s0 + $0x10] sm:$0xff] }
  0x18   :  { %1843 = vmatpush3.bf16.msra.mxu0 %v1967_v22  ;;  %v2010_v7 = vld [vmem:[%s2634_s2 + $0x1b8] sm:$0xff]   ;;  %v51_v9 = vcombine.high %v2342_v8, %v2342_v8  ;;  %v61_v12 = vpack.c.bf16 %v2342_v8, %v2342_v8 }
  0x19   :  { %1865 = vmatpush3.bf16.msra.mxu1 %v1968_v23  ;;  %1844 = vmatprep.subr.bf16.mxu0 %v1969_v24  ;;  %v2349_v10 = vld [vmem:[%s2632_s0 + $0x18] sm:$0xff] }
  0x1a   :  { %1866 = vmatprep.subr.bf16.mxu1 %v1970_v25  ;;  %v52_v11 = vcombine.high %v2349_v10, %v2349_v10 }
  0x1c   :  { %1845 = vmatpush3.bf16.msra.mxu0 %v1971_v26 }
  0x1d   :  { %1867 = vmatpush3.bf16.msra.mxu1 %v1972_v27  ;;  %1846 = vmatprep.subr.bf16.mxu0 %v1973_v28 }
  0x1e   :  { %1868 = vmatprep.subr.bf16.mxu1 %v1974_v29 }
  0x20   :  { %1847 = vmatpush3.bf16.msra.mxu0 %v1975_v30 }
  0x21   :  { %1869 = vmatpush3.bf16.msra.mxu1 %v1976_v31  ;;  %1876 = vmatprep.subr.bf16.mxu0 %v1979_v36 }
  0x22   :  { %1898 = vmatprep.subr.bf16.mxu1 %v1980_v39 }
  0x23   :  { %614 = vmatmul.mubr.bf16.vlgmr.msra.gmra.mrb[0].mxu0 %v57_v37 }
  0x24   :  { %654 = vmatmul.mubr.bf16.vlgmr.msra.gmra.mrb[0].mxu1 %v59_v38  ;;  %1877 = vmatpush3.bf16.msra.mxu0 %v1981_v42 }
  0x25   :  { %1899 = vmatpush3.bf16.msra.mxu1 %v1982_v43  ;;  %1878 = vmatprep.subr.bf16.mxu0 %v1983_v44 }
  0x26   :  { %1900 = vmatprep.subr.bf16.mxu1 %v1984_v45 }
  0x28   :  { %1879 = vmatpush3.bf16.msra.mxu0 %v1985_v46 }
  0x29   :  { %1901 = vmatpush3.bf16.msra.mxu1 %v1986_v47  ;;  %1880 = vmatprep.subr.bf16.mxu0 %v1987_v48 }
  0x2a   :  { %1902 = vmatprep.subr.bf16.mxu1 %v1988_v49 }
  0x2c   :  { %1881 = vmatpush3.bf16.msra.mxu0 %v1989_v50 }
  0x2d   :  { %1903 = vmatpush3.bf16.msra.mxu1 %v1990_v51  ;;  %1882 = vmatprep.subr.bf16.mxu0 %v1991_v52 }
  0x2e   :  { %1904 = vmatprep.subr.bf16.mxu1 %v1992_v53 }
  0x30   :  { %1883 = vmatpush3.bf16.msra.mxu0 %v1993_v54 }
  0x31   :  { %1905 = vmatpush3.bf16.msra.mxu1 %v1994_v55  ;;  %1884 = vmatprep.subr.bf16.mxu0 %v1995_v56 }
  0x32   :  { %1906 = vmatprep.subr.bf16.mxu1 %v1996_v57 }
  0x34   :  { %1885 = vmatpush3.bf16.msra.mxu0 %v1997_v58 }
  0x35   :  { %1907 = vmatpush3.bf16.msra.mxu1 %v1998_v59  ;;  %1886 = vmatprep.subr.bf16.mxu0 %v1999_v60 }
  0x36   :  { %1908 = vmatprep.subr.bf16.mxu1 %v2000_v61 }
  0x38   :  { %1887 = vmatpush3.bf16.msra.mxu0 %v2001_v62 }
  0x39   :  { %1909 = vmatpush3.bf16.msra.mxu1 %v2002_v63  ;;  %1888 = vmatprep.subr.bf16.mxu0 %v2003_v0 }
  0x3a   :  { %1910 = vmatprep.subr.bf16.mxu1 %v2004_v1 }
  0x3c   :  { %1889 = vmatpush3.bf16.msra.mxu0 %v2005_v2 }
  0x3d   :  { %1911 = vmatpush3.bf16.msra.mxu1 %v2006_v3  ;;  %1890 = vmatprep.subr.bf16.mxu0 %v2007_v4 }
  0x3e   :  { %1912 = vmatprep.subr.bf16.mxu1 %v2008_v5 }
  0x3f   :  { %17 = vsyncpa [#allocation3], 0  ;;  %v62_v13 = vpack.c.bf16 %v51_v9, %v51_v9  ;;  %v63_v14 = vpack.c.bf16 %v2349_v10, %v2349_v10  ;;  %v64_v15 = vpack.c.bf16 %v52_v11, %v52_v11  ;;  %v2013_v16 = vld [vmem:[%s2635_s3] sm:$0xff]   ;;  %v2063_v17 = vmov 0.0   ;;  %v2014_v18 = vld [vmem:[%s2635_s3 + $0x8] sm:$0xff]   ;;  %s2065_s24 = smov 8  }
  0x40   :  { %1891 = vmatpush3.bf16.msra.mxu0 %v2009_v6  ;;  %vm2064_vm0 = vmmov 0   ;;  %v39_v19 = vld [vmem:[%s2633_s1] sm:$0xf]  ;;  %vm763_vm1 = vcmask 261120   ;;  %vm870_vm2 = vcmask 1043456   ;;  %vm807_vm3 = vcmask 123904  }
  0x41   :  { %1913 = vmatpush3.bf16.msra.mxu1 %v2010_v7  ;;  %693 = vmatprep.mubr.bf16.mxu0 %v62_v13  ;;  %v1712_v22 = vld [vmem:[%s2639_s7] ss:$0 sm:$0xff]  ;;  %v1777_v50 = vld [vmem:[%s2639_s7 + $0x1] ss:$0 sm:$0xff]  ;;  %v824_v62 = vmul.f32 -0.5, %v39_v19  ;;  %vm822_vm4 = vcmask 60416   ;;  %v847_v7 = vlaneseq }
  0x42   :  { %733 = vmatprep.mubr.bf16.mxu1 %v64_v15  ;;  %1925 = vmatprep.subr.bf16.mxu0 %v2063_v17  ;;  %v861_v49 = vld [vmem:[%s2636_s4] sm:$0xf]  ;;  %s2066_s4 = smov 120   ;;  %v44_v63 = vld [vmem:[%s2639_s7 + $0x4] sm:$0x1]  ;;  %vm866_vm5 = vcmask 64512  }
  0x43   :  { %694 = vmatmul.mubr.bf16.vlgmr.msra.gmra.mrb[4].mxu0 %v61_v12  ;;  %1933 = vmatprep.subr.bf16.mxu1 %v2063_v17  ;;  %v872_v51 = vsel %vm870_vm2, %v861_v49, 0  ;;  %v825_v0 = vmul.f32 %v824_v62, %v39_v19  ;;  %v835_v1 = vsub.f32 0.0, %v44_v63  ;;  %v2384_v9 = vshrl.u32 %v847_v7, 7  ;;  %v1783_v12 = vld [vmem:[%s2639_s7 + $0x3] ss:$0 sm:$0xff]  ;;  %v934_v62 = vld [vmem:[%s2637_s5 + $0x90] sm:$0xff] }
  0x44   :  { %734 = vmatmul.mubr.bf16.vlgmr.msra.gmra.mrb[4].mxu1 %v63_v14  ;;  %1926 = vmatpush3.bf16.msra.mxu0 %v2013_v16  ;;  %v838_v11 = vmul.f32 -0.5, %v44_v63  ;;  %vm1680_vm6 = vcmask 3072   ;;  %v942_v63 = vld [vmem:[%s2637_s5 + $0xd0] sm:$0xff]  ;;  %v928_v7 = vld [vmem:[%s2637_s5 + $0x60] sm:$0xff] }
  0x45   :  { %1927 = vmatprep.subr.bf16.mxu0 %v2063_v17  ;;  %1929 = vmatprep.mubr.msk.bf16.mxu0 %vm2064_vm0, %v2063_v17  ;;  %v836_v5 = vmul.f32 1.442695, %v835_v1  ;;  %v2390_v15 = vsub.s32 0, %v2384_v9  ;;  %v943_v1 = vld [vmem:[%s2637_s5 + $0xd8] sm:$0xff] }
  0x46   :  { %1935 = vmatprep.mubr.msk.bf16.mxu1 %vm2064_vm0, %v2063_v17  ;;  %813 = vrot.lane.b32.xlu0 %v39_v19, %s2065_s24  ;;  %v1782_v19 = vadd.f32 -0.9189385, %v838_v11  ;;  %v921_v11 = vld [vmem:[%s2637_s5 + $0x28] sm:$0xff] }
  0x47   :  { %1934 = vmatpush3.bf16.msra.mxu1 %v872_v51  ;;  %v927_v51 = vld [vmem:[%s2637_s5 + $0x58] sm:$0xff] }
  0x48   :  { %1928 = vmatpush3.bf16.msra.mxu0 %v2014_v18 }
  0xb8   :  { %v814_v59 = vpop.permute.xlu0 %813 }
  0xf6   :  { %v1848_v20 = vpop.f32.mrb[0].mxu0 }
  0xf7   :  { %v1870_v21 = vpop.f32.mrb[0].mxu1  ;;  %v1849_v23 = vpop.f32.mrb[1].mxu0 }
  0xf8   :  { %v1871_v24 = vpop.f32.mrb[1].mxu1  ;;  %v1850_v25 = vadd.f32 %v1849_v23, %v1848_v20  ;;  %v1851_v27 = vpop.f32.mrb[2].mxu0  ;;  %v855_v23 = vrot.slane %v1782_v19, %v2390_v15  ;;  %v944_v19 = vld [vmem:[%s2637_s5 + $0xe0] sm:$0xff] }
  0xf9   :  { %v1872_v26 = vadd.f32 %v1871_v24, %v1870_v21  ;;  %v1873_v28 = vpop.f32.mrb[2].mxu1  ;;  %v1852_v29 = vpop.f32.mrb[3].mxu0  ;;  %v916_v27 = vld [vmem:[%s2637_s5] sm:$0xff] }
  0xfa   :  { %v1874_v30 = vpop.f32.mrb[3].mxu1  ;;  %v616_v31 = vadd.f32 %v1850_v25, %v1712_v22  ;;  %v924_v28 = vld [vmem:[%s2637_s5 + $0x40] sm:$0xff]  ;;  %v917_v29 = vld [vmem:[%s2637_s5 + $0x8] sm:$0xff] }
  0xfb   :  { %v1787_v30 = vcombine.high %v916_v27, %v924_v28 }
  0xfc   :  { %v656_v34 = vadd.f32 %v1872_v26, %v616_v31  ;;  %v925_v31 = vld [vmem:[%s2637_s5 + $0x48] sm:$0xff] }
  0xfd   :  { %1195 = vmatprep.subr.bf16.mxu0 %v1787_v30 }
 0x116   :  { %v1892_v35 = vpop.f32.mrb[4].mxu0 }
 0x117   :  { %v1914_v36 = vpop.f32.mrb[4].mxu1  ;;  %v1893_v37 = vpop.f32.mrb[5].mxu0 }
 0x118   :  { %v1894_v38 = vadd.f32 %v1893_v37, %v1892_v35  ;;  %v1915_v39 = vpop.f32.mrb[5].mxu1  ;;  %v1895_v40 = vpop.f32.mrb[6].mxu0  ;;  %v1788_v35 = vcombine.low %v917_v29, %v925_v31  ;;  %v932_v37 = vld [vmem:[%s2637_s5 + $0x80] sm:$0xff] }
 0x119   :  { %v1916_v41 = vadd.f32 %v1915_v39, %v1914_v36  ;;  %v1917_v42 = vpop.f32.mrb[6].mxu1  ;;  %v1896_v43 = vpop.f32.mrb[7].mxu0  ;;  %v1789_v36 = vcombine.high %v917_v29, %v925_v31  ;;  %v933_v39 = vld [vmem:[%s2637_s5 + $0x88] sm:$0xff]  ;;  %v931_v29 = vld [vmem:[%s2637_s5 + $0x78] sm:$0xff] }
 0x11a   :  { %v696_v44 = vadd.f32 %v1894_v38, %v656_v34  ;;  %v1918_v45 = vpop.f32.mrb[7].mxu1  ;;  %v1786_v34 = vcombine.low %v916_v27, %v924_v28  ;;  %v940_v38 = vld [vmem:[%s2637_s5 + $0xc0] sm:$0xff]  ;;  %v930_v27 = vld [vmem:[%s2637_s5 + $0x70] sm:$0xff]  ;;  %v923_v28 = vld [vmem:[%s2637_s5 + $0x38] sm:$0xff] }
 0x11b   :  { %1236 = vmatprep.subr.bf16.mxu1 %v1789_v36  ;;  %v1803_v40 = vcombine.high %v932_v37, %v940_v38  ;;  %v1802_v42 = vcombine.low %v932_v37, %v940_v38  ;;  %v918_v45 = vld [vmem:[%s2637_s5 + $0x10] sm:$0xff]  ;;  %v939_v38 = vld [vmem:[%s2637_s5 + $0xb8] sm:$0xff] }
 0x11c   :  { %v736_v46 = vadd.f32 %v1916_v41, %v696_v44  ;;  %v941_v41 = vld [vmem:[%s2637_s5 + $0xc8] sm:$0xff]  ;;  %v938_v36 = vld [vmem:[%s2637_s5 + $0xb0] sm:$0xff] }
 0x11d   :  { %v1804_v43 = vcombine.low %v933_v39, %v941_v41  ;;  %v1805_v44 = vcombine.high %v933_v39, %v941_v41  ;;  %v946_v37 = vld [vmem:[%s2637_s5 + $0xf0] sm:$0xff]  ;;  %v947_v39 = vld [vmem:[%s2637_s5 + $0xf8] sm:$0xff]  ;;  %v1800_v41 = vcombine.low %v923_v28, %v931_v29 }
 0x11e   :  { %2015 = vtanh.f32 %v736_v46  ;;  %v926_v46 = vld [vmem:[%s2637_s5 + $0x50] sm:$0xff] }
 0x11f   :  { %v1790_v49 = vcombine.low %v918_v45, %v926_v46 }
 0x128   :  { %v2016_v47 = vpop.eup %2015 }
 0x129   :  { %v742_v48 = vpack.c.bf16 %v2016_v47, %v2016_v47  ;;  %v919_v47 = vld [vmem:[%s2637_s5 + $0x18] sm:$0xff] }
 0x12b   :  { %1930 = vmatmul.mubr.msk.bf16.vlgmr.msra.gmra.mrb[8].mxu0 %vm763_vm1, %v742_v48  ;;  %v2067_v48 = vmov 0  }
 0x12c   :  { %1196 = vmatpush1.bf16.msra.mxu0 %v1786_v34  ;;  %1227 = vmatprep.mubr.bf16.mxu0 %v2067_v48 }
 0x12d   :  { %1197 = vmatprep.subr.bf16.mxu0 %v1803_v40 }
 0x130   :  { %1198 = vmatpush1.bf16.msra.mxu0 %v1802_v42  ;;  %v1815_v42 = vcombine.high %v938_v36, %v946_v37 }
 0x1fe   :  { %v801_v52 = vpop.f32.mrb[8].mxu0 }
 0x1ff   :  { %v802_v53 = vadd.f32 %v1777_v50, %v801_v52  ;;  %v1931_v54 = vpop.f32.mrb[9].mxu0  ;;  %v1791_v50 = vcombine.high %v918_v45, %v926_v46  ;;  %v1792_v52 = vcombine.low %v919_v47, %v927_v51  ;;  %v1816_v45 = vcombine.low %v939_v38, %v947_v39 }
 0x200   :  { %v804_v55 = vpop.f32.mrb[10].mxu0  ;;  %v962_v46 = vsub.s32 2, %v2384_v9 }
 0x201   :  { %808 = vst.msk [vmem:[%s2640_s8] sm:$0x3] %vm807_vm3, %v802_v53  ;;  %v1932_v56 = vpop.f32.mrb[11].mxu0  ;;  %v809_v57 = vmul.f32 0.5, %v802_v53  ;;  %1277 = vmatprep.subr.bf16.mxu0 %v1791_v50  ;;  %v966_v50 = vsub.s32 3, %v2384_v9 }
 0x202   :  { %v1784_v56 = vld [vmem:[%s2639_s7 + $0x2] ss:$0 sm:$0xff] }
 0x203   :  { %827 = vrot.lane.b32.xlu1 %v809_v57, %s2066_s4  ;;  %v810_v58 = vmul.f32 1.442695, %v809_v57 }
 0x205   :  { %2017 = vpow2.f32 %v810_v58 }
 0x206   :  { %2019 = vpow2.f32 %v836_v5 }
 0x20f   :  { %v2018_v60 = vpop.eup %2017 }
 0x210   :  { %v816_v61 = vmul.f32 %v2018_v60, %v814_v59  ;;  %v2020_v16 = vpop.eup %2019 }
 0x211   :  { %v850_v21 = vrot.slane %v2020_v16, %v2390_v15 }
 0x212   :  { %818 = vrot.lane.b32.xlu0 %v816_v61, %s2066_s4 }
 0x275   :  { %v828_v2 = vpop.permute.xlu1 %827 }
 0x276   :  { %v830_v3 = vsub.f32 %v825_v0, %v828_v2  ;;  %v935_v0 = vld [vmem:[%s2637_s5 + $0x98] sm:$0xff] }
 0x277   :  { %v1809_v5 = vcombine.high %v935_v0, %v943_v1 }
 0x278   :  { %v1781_v4 = vadd.f32 -0.9189385, %v830_v3 }
 0x27a   :  { %v832_v6 = vsel %vm822_vm4, %v1781_v4, 0.0  ;;  %v1807_v4 = vcombine.high %v934_v62, %v942_v63 }
 0x27b   :  { %833 = vadd.xlane.f32.xlu1 %v832_v6  ;;  %v920_v6 = vld [vmem:[%s2637_s5 + $0x20] sm:$0xff] }
 0x27c   :  { %v1795_v16 = vcombine.high %v920_v6, %v928_v7 }
 0x284   :  { %v819_v13 = vpop.permute.xlu0 %818 }
 0x285   :  { %v821_v14 = vadd.f32 %v819_v13, %v802_v53  ;;  %v1793_v53 = vcombine.high %v919_v47, %v927_v51  ;;  %v1806_v13 = vcombine.low %v934_v62, %v942_v63  ;;  %v948_v47 = vld [vmem:[%s2638_s6] sm:$0xff] }
 0x286   :  { %v963_v51 = vrot.slane %v948_v47, %v962_v46 }
 0x287   :  { %v844_v17 = vsub.f32 %v821_v14, %v1783_v12  ;;  %v860_v18 = vpack.c.bf16 %v821_v14, %v821_v14  ;;  %823 = vst.msk [vmem:[#allocation2] sm:$0xf] %vm822_vm4, %v821_v14  ;;  %v929_v12 = vld [vmem:[%s2637_s5 + $0x68] sm:$0xff]  ;;  %v1808_v14 = vcombine.low %v935_v0, %v943_v1 }
 0x289   :  { %v845_v20 = vmul.f32 -0.5, %v844_v17  ;;  %1936 = vmatmul.mubr.msk.bf16.vlgmr.msra.gmra.mrb[8].mxu1 %vm866_vm5, %v860_v18  ;;  %v936_v18 = vld [vmem:[%s2637_s5 + $0xa0] sm:$0xff] }
 0x28a   :  { %1237 = vmatpush1.bf16.msra.mxu1 %v1788_v35  ;;  %1268 = vmatprep.mubr.bf16.mxu1 %v2067_v48  ;;  %v1810_v30 = vcombine.low %v936_v18, %v944_v19  ;;  %v1801_v35 = vcombine.high %v923_v28, %v931_v29 }
 0x28b   :  { %v846_v22 = vmul.f32 %v845_v20, %v844_v17  ;;  %1238 = vmatprep.subr.bf16.mxu1 %v1805_v44  ;;  %v1797_v17 = vcombine.high %v921_v11, %v929_v12  ;;  %v937_v20 = vld [vmem:[%s2637_s5 + $0xa8] sm:$0xff]  ;;  %v1814_v44 = vcombine.low %v938_v36, %v946_v37 }
 0x28d   :  { %v851_v24 = vmul.f32 %v850_v21, %v846_v22  ;;  %v945_v21 = vld [vmem:[%s2637_s5 + $0xe8] sm:$0xff]  ;;  %v1794_v22 = vcombine.low %v920_v6, %v928_v7 }
 0x28e   :  { %1239 = vmatpush1.bf16.msra.mxu1 %v1804_v43  ;;  %v1812_v31 = vcombine.low %v937_v20, %v945_v21  ;;  %v1817_v43 = vcombine.high %v939_v38, %v947_v39 }
 0x28f   :  { %v856_v25 = vadd.f32 %v855_v23, %v851_v24  ;;  %1318 = vmatprep.subr.bf16.mxu1 %v1793_v53  ;;  %v1796_v23 = vcombine.low %v921_v11, %v929_v12  ;;  %v1811_v24 = vcombine.high %v936_v18, %v944_v19  ;;  %v967_v53 = vrot.slane %v948_v47, %v966_v50 }
 0x291   :  { %v857_v26 = vsel %vm822_vm4, %v856_v25, 0.0  ;;  %v1813_v25 = vcombine.high %v937_v20, %v945_v21 }
 0x292   :  { %858 = vadd.xlane.f32.xlu0 %v857_v26  ;;  %v922_v26 = vld [vmem:[%s2637_s5 + $0x30] sm:$0xff] }
 0x293   :  { %v1799_v34 = vcombine.high %v922_v26, %v930_v27  ;;  %v1798_v40 = vcombine.low %v922_v26, %v930_v27  ;;  %v949_v26 = vld [vmem:[%s2638_s6 + $0x8] sm:$0xff] }
 0x294   :  { %v999_v36 = vrot.slane %v949_v26, %v966_v50 }
 0x308   :  { %v834_v54 = vpop.xlane.xlu1 %833 }
 0x309   :  { %1681 = vst.msk [vmem:[%s2643_s11] sm:$0xf] %vm1680_vm6, %v834_v54 }
 0x31f   :  { %v859_v55 = vpop.xlane.xlu0 %858 }
 0x320   :  { %1830 = vst.msk [vmem:[%s2643_s11 + $0x4] sm:$0xf] %vm1680_vm6, %v859_v55 }
 0x35c   :  { %v908_v57 = vpop.f32.mrb[8].mxu1 }
 0x35d   :  { %v909_v58 = vadd.f32 %v1784_v56, %v908_v57  ;;  %v1937_v59 = vpop.f32.mrb[9].mxu1 }
 0x35e   :  { %v911_v60 = vpop.f32.mrb[10].mxu1 }
 0x35f   :  { %2021 = vtanh.f32 %v909_v58  ;;  %v1938_v61 = vpop.f32.mrb[11].mxu1  ;;  %v970_v60 = vsub.s32 4, %v2384_v9 }
 0x360   :  { %v978_v61 = vsub.s32 6, %v2384_v9 }
 0x361   :  { %v971_v11 = vrot.slane %v948_v47, %v970_v60 }
 0x362   :  { %v979_v12 = vrot.slane %v948_v47, %v978_v61 }
 0x369   :  { %v2022_v2 = vpop.eup %2021 }
 0x36a   :  { %v2457_v3 = vpack.c.bf16 %v2022_v2, %v2022_v2  ;;  %v974_v2 = vsub.s32 5, %v2384_v9 }
 0x36c   :  { %1818 = vmatmul.mubr.msk.bf16.vlgmr.msra.gmra.mrb[12].mxu0 %vm763_vm1, %v2457_v3  ;;  %1819 = vmatmul.mubr.msk.bf16.vlgmr.msra.gmra.mrb[12].mxu1 %vm763_vm1, %v2457_v3 }
 0x36d   :  { %1278 = vmatpush1.bf16.msra.mxu0 %v1790_v49  ;;  %1319 = vmatpush1.bf16.msra.mxu1 %v1792_v52  ;;  %v958_v49 = vsub.s32 1, %v2384_v9 }
 0x36e   :  { %1279 = vmatprep.subr.bf16.mxu0 %v1807_v4  ;;  %1320 = vmatprep.subr.bf16.mxu1 %v1809_v5 }
 0x36f   :  { %1309 = vmatprep.mubr.bf16.mxu0 %v2067_v48  ;;  %1350 = vmatprep.mubr.bf16.mxu1 %v2067_v48  ;;  %v959_v52 = vrot.slane %v948_v47, %v958_v49 }
 0x371   :  { %1280 = vmatpush1.bf16.msra.mxu0 %v1806_v13  ;;  %1321 = vmatpush1.bf16.msra.mxu1 %v1808_v14  ;;  %v975_v13 = vrot.slane %v948_v47, %v974_v2 }
 0x372   :  { %1359 = vmatprep.subr.bf16.mxu0 %v1795_v16  ;;  %1400 = vmatprep.subr.bf16.mxu1 %v1797_v17 }
 0x374   :  { %1820 = vmatmul.mubr.msk.bf16.vlgmr.msra.gmra.mrb[16].mxu0 %vm763_vm1, %v2457_v3  ;;  %1821 = vmatmul.mubr.msk.bf16.vlgmr.msra.gmra.mrb[16].mxu1 %vm763_vm1, %v2457_v3 }
 0x375   :  { %1360 = vmatpush1.bf16.msra.mxu0 %v1794_v22  ;;  %1401 = vmatpush1.bf16.msra.mxu1 %v1796_v23 }
 0x376   :  { %1361 = vmatprep.subr.bf16.mxu0 %v1811_v24  ;;  %1402 = vmatprep.subr.bf16.mxu1 %v1813_v25 }
 0x377   :  { %1391 = vmatprep.mubr.bf16.mxu0 %v2067_v48  ;;  %1432 = vmatprep.mubr.bf16.mxu1 %v2067_v48 }
 0x379   :  { %1362 = vmatpush1.bf16.msra.mxu0 %v1810_v30  ;;  %1403 = vmatpush1.bf16.msra.mxu1 %v1812_v31  ;;  %v987_v31 = vrot.slane %v949_v26, %v2390_v15 }
 0x37a   :  { %1441 = vmatprep.subr.bf16.mxu0 %v1799_v34  ;;  %1482 = vmatprep.subr.bf16.mxu1 %v1801_v35  ;;  %v995_v34 = vrot.slane %v949_v26, %v962_v46  ;;  %v991_v35 = vrot.slane %v949_v26, %v958_v49  ;;  %v1003_v46 = vrot.slane %v949_v26, %v970_v60 }
 0x37c   :  { %1822 = vmatmul.mubr.msk.bf16.vlgmr.msra.gmra.mrb[20].mxu0 %vm763_vm1, %v2457_v3  ;;  %1823 = vmatmul.mubr.msk.bf16.vlgmr.msra.gmra.mrb[20].mxu1 %vm763_vm1, %v2457_v3 }
 0x37d   :  { %1442 = vmatpush1.bf16.msra.mxu0 %v1798_v40  ;;  %1483 = vmatpush1.bf16.msra.mxu1 %v1800_v41 }
 0x37e   :  { %1443 = vmatprep.subr.bf16.mxu0 %v1815_v42  ;;  %1484 = vmatprep.subr.bf16.mxu1 %v1817_v43 }
 0x37f   :  { %1473 = vmatprep.mubr.bf16.mxu0 %v2067_v48  ;;  %1514 = vmatprep.mubr.bf16.mxu1 %v2067_v48  ;;  %v955_v48 = vrot.slane %v948_v47, %v2390_v15 }
 0x381   :  { %1444 = vmatpush1.bf16.msra.mxu0 %v1814_v44  ;;  %1485 = vmatpush1.bf16.msra.mxu1 %v1816_v45 }
 0x384   :  { %1824 = vmatmul.mubr.msk.bf16.vlgmr.msra.gmra.mrb[24].mxu0 %vm763_vm1, %v2457_v3  ;;  %1825 = vmatmul.mubr.msk.bf16.vlgmr.msra.gmra.mrb[24].mxu1 %vm763_vm1, %v2457_v3  ;;  %v982_v3 = vsub.s32 7, %v2384_v9 }
 0x386   :  { %v983_v14 = vrot.slane %v948_v47, %v982_v3  ;;  %v1011_v47 = vrot.slane %v949_v26, %v978_v61 }
 0x43f   :  { %v1229_v54 = vpop.f32.mrb[12].mxu0  ;;  %v1270_v55 = vpop.f32.mrb[12].mxu1 }
 0x440   :  { %v1230_v56 = vadd.f32 %v1229_v54, %v955_v48  ;;  %v1271_v57 = vadd.f32 %v1270_v55, %v963_v51  ;;  %v1231_v58 = vpop.f32.mrb[13].mxu0  ;;  %v1272_v59 = vpop.f32.mrb[13].mxu1 }
 0x441   :  { %v1232_v62 = vadd.f32 %v1231_v58, %v959_v52  ;;  %v1273_v63 = vadd.f32 %v1272_v59, %v967_v53  ;;  %v1233_v0 = vpop.f32.mrb[14].mxu0  ;;  %v1274_v1 = vpop.f32.mrb[14].mxu1 }
 0x442   :  { %v1234_v4 = vpop.f32.mrb[15].mxu0  ;;  %v1275_v5 = vpop.f32.mrb[15].mxu1  ;;  %v1007_v0 = vrot.slane %v949_v26, %v974_v2  ;;  %v1015_v1 = vrot.slane %v949_v26, %v982_v3 }
 0x443   :  { %v2540_v6 = vcombine.low %v1230_v56, %v1232_v62  ;;  %v2542_v7 = vcombine.low %v1271_v57, %v1273_v63 }
 0x445   :  { %1555 = vst [vmem:[%s2642_s10] sm:$0xff] %v2540_v6  ;;  %1556 = vst [vmem:[%s2642_s10 + $0x8] sm:$0xff] %v2542_v7  ;;  %v1564_v9 = vsub.f32 %v2233_v33, %v2542_v7 }
 0x447   :  { %v1311_v16 = vpop.f32.mrb[16].mxu0  ;;  %v1352_v17 = vpop.f32.mrb[16].mxu1 }
 0x448   :  { %v1312_v18 = vadd.f32 %v1311_v16, %v971_v11  ;;  %v1353_v19 = vadd.f32 %v1352_v17, %v979_v12  ;;  %v1313_v20 = vpop.f32.mrb[17].mxu0  ;;  %v1354_v21 = vpop.f32.mrb[17].mxu1 }
 0x449   :  { %v1314_v22 = vadd.f32 %v1313_v20, %v975_v13  ;;  %v1355_v23 = vadd.f32 %v1354_v21, %v983_v14  ;;  %v1315_v24 = vpop.f32.mrb[18].mxu0  ;;  %v1356_v25 = vpop.f32.mrb[18].mxu1  ;;  %v1563_v13 = vsub.f32 %v2228_v32, %v2540_v6 }
 0x44a   :  { %v1316_v27 = vpop.f32.mrb[19].mxu0  ;;  %v1357_v28 = vpop.f32.mrb[19].mxu1 }
 0x44b   :  { %v2559_v29 = vcombine.low %v1312_v18, %v1314_v22  ;;  %v2561_v30 = vcombine.low %v1353_v19, %v1355_v23 }
 0x44d   :  { %1557 = vst [vmem:[%s2642_s10 + $0x10] sm:$0xff] %v2559_v29  ;;  %1558 = vst [vmem:[%s2642_s10 + $0x18] sm:$0xff] %v2561_v30 }
 0x44f   :  { %v1393_v37 = vpop.f32.mrb[20].mxu0  ;;  %v1434_v38 = vpop.f32.mrb[20].mxu1 }
 0x450   :  { %v1394_v39 = vadd.f32 %v1393_v37, %v987_v31  ;;  %v1435_v40 = vadd.f32 %v1434_v38, %v995_v34  ;;  %v1395_v41 = vpop.f32.mrb[21].mxu0  ;;  %v1436_v42 = vpop.f32.mrb[21].mxu1 }
 0x451   :  { %v1396_v15 = vadd.f32 %v1395_v41, %v991_v35  ;;  %v1437_v43 = vadd.f32 %v1436_v42, %v999_v36  ;;  %v1397_v44 = vpop.f32.mrb[22].mxu0  ;;  %v1438_v45 = vpop.f32.mrb[22].mxu1  ;;  %v1568_v41 = vmul.f32 -0.5, %v1564_v9 }
 0x452   :  { %v1575_v48 = vsub.f32 0.0, %v1394_v39  ;;  %v2572_v51 = vmul.f32 0.5, %v1394_v39  ;;  %v1577_v52 = vsub.f32 0.0, %v1435_v40  ;;  %v2574_v53 = vmul.f32 0.5, %v1435_v40  ;;  %v1398_v49 = vpop.f32.mrb[23].mxu0  ;;  %v1439_v50 = vpop.f32.mrb[23].mxu1 }
 0x453   :  { %v1543_v54 = vcombine.low %v1394_v39, %v1396_v15  ;;  %v1576_v55 = vsub.f32 0.0, %v1396_v15  ;;  %v2576_v56 = vmul.f32 0.5, %v1396_v15  ;;  %v1544_v57 = vcombine.low %v1435_v40, %v1437_v43 }
 0x454   :  { %v1583_v58 = vmul.f32 1.442695, %v1575_v48  ;;  %v1587_v59 = vmul.f32 1.442695, %v1577_v52  ;;  %v1578_v62 = vsub.f32 0.0, %v1437_v43  ;;  %v2578_v63 = vmul.f32 0.5, %v1437_v43 }
 0x455   :  { %1559 = vst [vmem:[%s2642_s10 + $0x20] sm:$0xff] %v1543_v54  ;;  %v1585_v60 = vmul.f32 1.442695, %v1576_v55  ;;  %v1635_v61 = vcombine.low %v2572_v51, %v2576_v56  ;;  %1560 = vst [vmem:[%s2642_s10 + $0x28] sm:$0xff] %v1544_v57  ;;  %v1567_v39 = vmul.f32 -0.5, %v1563_v13  ;;  %v1565_v45 = vsub.f32 %v2342_v8, %v2559_v29 }
 0x456   :  { %2023 = vpow2.f32 %v1583_v58  ;;  %v1589_v4 = vmul.f32 1.442695, %v1578_v62  ;;  %v1636_v5 = vcombine.low %v2574_v53, %v2578_v63  ;;  %v1566_v48 = vsub.f32 %v2349_v10, %v2561_v30 }
 0x457   :  { %2025 = vpow2.f32 %v1587_v59  ;;  %v1475_v11 = vpop.f32.mrb[24].mxu0  ;;  %v1516_v12 = vpop.f32.mrb[24].mxu1  ;;  %v1571_v44 = vmul.f32 %v1567_v39, %v1563_v13  ;;  %v1569_v49 = vmul.f32 -0.5, %v1565_v45 }
 0x458   :  { %2027 = vpow2.f32 %v1585_v60  ;;  %v1476_v14 = vadd.f32 %v1475_v11, %v1003_v46  ;;  %v1517_v16 = vadd.f32 %v1516_v12, %v1011_v47  ;;  %v1477_v17 = vpop.f32.mrb[25].mxu0  ;;  %v1518_v18 = vpop.f32.mrb[25].mxu1  ;;  %v1572_v47 = vmul.f32 %v1568_v41, %v1564_v9 }
 0x459   :  { %2029 = vpow2.f32 %v1589_v4  ;;  %v1478_v2 = vadd.f32 %v1477_v17, %v1007_v0  ;;  %v1519_v3 = vadd.f32 %v1518_v18, %v1015_v1  ;;  %v1479_v19 = vpop.f32.mrb[26].mxu0  ;;  %v1520_v20 = vpop.f32.mrb[26].mxu1  ;;  %v1570_v55 = vmul.f32 -0.5, %v1566_v48 }
 0x45a   :  { %v1579_v21 = vsub.f32 0.0, %v1476_v14  ;;  %v1623_v22 = vmul.f32 0.5, %v1476_v14  ;;  %v1581_v23 = vsub.f32 0.0, %v1517_v16  ;;  %v1625_v24 = vmul.f32 0.5, %v1517_v16  ;;  %v1480_v25 = vpop.f32.mrb[27].mxu0  ;;  %v1521_v26 = vpop.f32.mrb[27].mxu1 }
 0x45b   :  { %v1545_v32 = vcombine.low %v1476_v14, %v1478_v2  ;;  %v1580_v6 = vsub.f32 0.0, %v1478_v2  ;;  %v1624_v27 = vmul.f32 0.5, %v1478_v2  ;;  %v1546_v28 = vcombine.low %v1517_v16, %v1519_v3 }
 0x45c   :  { %v1591_v31 = vmul.f32 1.442695, %v1579_v21  ;;  %v1595_v34 = vmul.f32 1.442695, %v1581_v23  ;;  %v1582_v35 = vsub.f32 0.0, %v1519_v3  ;;  %v1626_v36 = vmul.f32 0.5, %v1519_v3 }
 0x45d   :  { %1561 = vst [vmem:[%s2642_s10 + $0x30] sm:$0xff] %v1545_v32  ;;  %v1593_v33 = vmul.f32 1.442695, %v1580_v6  ;;  %v1637_v7 = vcombine.low %v1623_v22, %v1624_v27  ;;  %1562 = vst [vmem:[%s2642_s10 + $0x38] sm:$0xff] %v1546_v28  ;;  %v1573_v60 = vmul.f32 %v1569_v49, %v1565_v45  ;;  %v1574_v0 = vmul.f32 %v1570_v55, %v1566_v48  ;;  %s2068_s10 = smov [#allocation2]  }
 0x45e   :  { %2031 = vpow2.f32 %v1591_v31  ;;  %v1597_v37 = vmul.f32 1.442695, %v1582_v35  ;;  %v1638_v38 = vcombine.low %v1625_v24, %v1626_v36  ;;  %s1694_s24 = sshll.u32 %s2068_s10, 4  ;;  %s1695_s24 = int_to_ptr.vmem [resolvable:$true] %s1694_s24 }
 0x45f   :  { %2033 = vpow2.f32 %v1595_v34  ;;  %s2039_s7 = scalar_lea.vmem %s1695_s24, 64  ;;  %p2044_p1 = scmp.lt.s32.totalorder %s1695_s24, %s1695_s24 }
 0x460   :  { %v2024_v40 = vpop.eup %2023  ;;  %2035 = vpow2.f32 %v1593_v33  ;;  %p2040_p0 = scmp.ne.s32.totalorder %s1695_s24, %s2039_s7  ;;  %p2045_p2 = scmp.lt.s32.totalorder %s2039_s7, %s2039_s7 }
 0x461   :  { %v2026_v42 = vpop.eup %2025  ;;  %2037 = vpow2.f32 %v1597_v37 }
 0x462   :  { %v2028_v15 = vpop.eup %2027  ;;  %p2046_p3 = por %p2045_p2, %p2044_p1 }
 0x463   :  { %v2030_v43 = vpop.eup %2029  ;;  %v1607_v46 = vcombine.low %v2024_v40, %v2028_v15 }
 0x464   :  { %v1608_v51 = vcombine.low %v2026_v42, %v2030_v43  ;;  %p2047_p4 = pnand %p2046_p3, %p2040_p0 }
 0x465   :  { %v1615_v52 = vmul.f32 %v1607_v46, %v1571_v44 }
 0x466   :  { %v1616_v53 = vmul.f32 %v1608_v51, %v1572_v47 }
 0x467   :  { %v1643_v50 = vsub.f32 %v1615_v52, %v1635_v61 }
 0x468   :  { %v2032_v54 = vpop.eup %2031  ;;  %v1644_v56 = vsub.f32 %v1616_v53, %v1636_v5 }
 0x469   :  { %v2034_v57 = vpop.eup %2033  ;;  %v1826_v58 = vadd.f32 -0.9189385, %v1643_v50 }
 0x46a   :  { %v2036_v59 = vpop.eup %2035  ;;  %v1827_v62 = vadd.f32 -0.9189385, %v1644_v56 }
 0x46b   :  { %v2038_v63 = vpop.eup %2037  ;;  %v1655_v8 = vcombine.high %v1826_v58, %v1826_v58  ;;  %v1609_v29 = vcombine.low %v2032_v54, %v2036_v59  ;;  %v1663_v10 = vsel %vm870_vm2, %v1826_v58, 0.0 }
 0x46c   :  { %v1610_v1 = vcombine.low %v2034_v57, %v2038_v63  ;;  %v1656_v4 = vcombine.high %v1827_v62, %v1827_v62  ;;  %v1666_v5 = vsel %vm870_vm2, %v1827_v62, 0.0 }
 0x46d   :  { %v1664_v30 = vsel %vm870_vm2, %v1655_v8, 0.0  ;;  %v1617_v11 = vmul.f32 %v1609_v29, %v1573_v60 }
 0x46e   :  { %v1665_v61 = vadd.f32 %v1664_v30, %v1663_v10  ;;  %v1618_v12 = vmul.f32 %v1610_v1, %v1574_v0  ;;  %v1668_v18 = vsel %vm870_vm2, %v1656_v4, 0.0 }
 0x46f   :  { %v1645_v13 = vsub.f32 %v1617_v11, %v1637_v7 }
 0x470   :  { %v1646_v14 = vsub.f32 %v1618_v12, %v1638_v38  ;;  %v1667_v16 = vadd.f32 %v1666_v5, %v1665_v61 }
 0x471   :  { %v1828_v17 = vadd.f32 -0.9189385, %v1645_v13 }
 0x472   :  { %v1829_v9 = vadd.f32 -0.9189385, %v1646_v14  ;;  %v1669_v2 = vadd.f32 %v1668_v18, %v1667_v16 }
 0x473   :  { %v1657_v3 = vcombine.high %v1828_v17, %v1828_v17  ;;  %v1670_v19 = vsel %vm870_vm2, %v1828_v17, 0.0 }
 0x474   :  { %v1671_v20 = vadd.f32 %v1670_v19, %v1669_v2  ;;  %v1658_v21 = vcombine.high %v1829_v9, %v1829_v9  ;;  %v1674_v24 = vsel %vm870_vm2, %v1829_v9, 0.0 }
 0x475   :  { %v1672_v22 = vsel %vm870_vm2, %v1657_v3, 0.0 }
 0x476   :  { %v1673_v23 = vadd.f32 %v1672_v22, %v1671_v20  ;;  %v1676_v26 = vsel %vm870_vm2, %v1658_v21, 0.0 }
 0x478   :  { %v1675_v25 = vadd.f32 %v1674_v24, %v1673_v23 }
 0x47a   :  { %v1677_v32 = vadd.f32 %v1676_v26, %v1675_v25 }
 0x47c   :  { %1678 = vadd.xlane.f32.xlu0 %v1677_v32 }
 0x47d   :  { %2050 = shalt.err (!%p2047_p4)
}
 0x47e   :  { %s2051_s1 = scalar_lea.hbm %s2641_s9, 64 }
 0x47f   :  { %p2052_p5 = scmp.ne.s32.totalorder %s2641_s9, %s2051_s1  ;;  %p2055_p6 = scmp.lt.u32.totalorder %s2051_s1, %s2641_s9 }
 0x481   :  { %p2057_p7 = pnand %p2055_p6, %p2052_p5 }
 0x483   :  { %2060 = shalt.err (!%p2057_p7)
}
 0x484   :  { %1697 = dma.vmem_to_hbm [thread:$0]  %s1695_s24, 64, %s2641_s9, [#allocation3]  }
 0x509   :  { %v1679_v6 = vpop.xlane.xlu0 %1678 }
 0x50a   :  { %1831 = vst.msk [vmem:[%s2643_s11 + $0x8] sm:$0xf] %vm1680_vm6, %v1679_v6 }
 0x50b   :  { %2061 = dma.done.wait [#allocation3], 64  }
 0x50c   :  { %2062 = vsyncadd [#allocation3], 4294967232 }
 0x50d   :  { %1711 = vsyncpa [#allocation3], 1 }

</bundles_post_ra>
